<compile_context>
chip_gen: v5e
topology: v5e:2x2
jax: 0.10.0
libtpu: 0.0.40
codegen_flags: <defaults>
</compile_context>

<pallas_src>
import functools

import jax
import jax.numpy as jnp
from jax.experimental import pallas as pl
from jax.experimental.pallas import tpu as pltpu

LANES = 128
CHUNK_R = 256          # rows per inner accumulation sub-chunk (multiple of 8)


def _rmsd_kernel(out_ref, tgt_ref, res_ref, acc_ref, *,
                 rows, tile_r, chunk, inner, needs_mask, unroll):
    # out_ref/tgt_ref: (tile_r, LANES) tiles of output / target (native dtype)
    # res_ref:         (1, 1) per-split partial sum of squared diffs
    # acc_ref:         (8, LANES) f32 VMEM running partial sums
    s = pl.program_id(0)
    k = pl.program_id(1)

    @pl.when(k == 0)
    def _():
        acc_ref[...] = jnp.zeros_like(acc_ref)

    row0 = (s * inner + k) * tile_r
    n_chunks = tile_r // chunk

    def accumulate(masked):
        def body(c, acc):
            r = pl.multiple_of(c * chunk, chunk)
            o = out_ref[pl.ds(r, chunk), :].astype(jnp.float32)
            t = tgt_ref[pl.ds(r, chunk), :].astype(jnp.float32)
            d = o - t
            if masked:
                # Rows past `rows` hold junk from the partial / phantom block
                # DMA; select (not multiply) so NaN padding never leaks in.
                rid = (jax.lax.broadcasted_iota(jnp.int32, (chunk, LANES), 0)
                       + (row0 + r))
                d = jnp.where(rid < rows, d, 0.0)
            # (chunk, 128) -> (chunk//8, 8, 128), reduce the leading axis:
            # pure vreg-wise VPU adds, no per-step cross-lane reduce.
            return acc + jnp.sum((d * d).reshape(-1, 8, LANES), axis=0)

        part = jax.lax.fori_loop(0, n_chunks, body,
                                 jnp.zeros((8, LANES), jnp.float32),
                                 unroll=unroll)
        acc_ref[...] += part

    if needs_mask:
        # Only the step(s) whose row range crosses the slab tail pay for the
        # iota/compare/select; interior steps take the unmasked fast path.
        @pl.when(row0 + tile_r <= rows)
        def _():
            accumulate(False)

        @pl.when(row0 + tile_r > rows)
        def _():
            accumulate(True)
    else:
        accumulate(False)

    @pl.when(k == pl.num_programs(1) - 1)
    def _():
        res_ref[...] = jnp.sum(acc_ref[...]).reshape(1, 1)


def _device_kind():
    try:
        return jax.devices()[0].device_kind.lower()
    except Exception:
        return ""


@functools.lru_cache(maxsize=None)
def _hw_config():
    kind = _device_kind()
    # Multi-TensorCore-per-device chips benefit from the 2-way split;
    # single-TC parts (v5e / v6e) skip it entirely.
    multi_tc = any(tag in kind for tag in ("v4", "v5p", "v7"))
    # ~2 MiB / input block on v5e (lower HBM BW already hides the per-step
    # overhead), ~4 MiB on newer parts, conservative fallback when unknown.
    if "v5" in kind and ("lite" in kind or "v5e" in kind):
        target_block_bytes = 2 << 20
    elif kind:
        target_block_bytes = 4 << 20
    else:
        target_block_bytes = 2 << 20
    return multi_tc, target_block_bytes


def rmsd_loss(output, target):
    if output.shape != target.shape:
        raise ValueError(
            "Output and target must have the same shape for RMSD calculation.")
    n_elems = int(output.size)
    if n_elems == 0:
        # torch.mean of an empty tensor is NaN; match that.
        return jnp.float32(jnp.nan)

    multi_tc, target_block_bytes = _hw_config()
    itemsize = max(jnp.dtype(output.dtype).itemsize,
                   jnp.dtype(target.dtype).itemsize)

    pad_elems = (-n_elems) % LANES
    rows = (n_elems + pad_elems) // LANES

    def to_slab(x):
        flat = jnp.ravel(x)                       # keep native dtype
        if pad_elems:
            # Only when numel % 128 != 0; zeros on BOTH operands, so the
            # padded tail contributes exactly 0 to the sum.
            flat = jnp.pad(flat, (0, pad_elems))
        return flat.reshape(rows, LANES)          # copy-free when no pad

    out_slab = to_slab(output)
    tgt_slab = to_slab(target)

    # ---- tile / grid selection (dtype & generation aware) -----------------
    if rows <= CHUNK_R:
        tile_r = ((rows + 7) // 8) * 8            # single sublane-aligned block
        chunk = tile_r
    else:
        row_bytes = LANES * itemsize
        tile_r_target = max(
            CHUNK_R, (target_block_bytes // row_bytes) // CHUNK_R * CHUNK_R)
        tile_r = min(tile_r_target, pl.cdiv(rows, CHUNK_R) * CHUNK_R)
        chunk = CHUNK_R

    num_blocks = pl.cdiv(rows, tile_r)
    num_splits = 2 if (multi_tc and num_blocks >= 2) else 1
    inner = pl.cdiv(num_blocks, num_splits)
    has_phantom = num_splits * inner != num_blocks
    needs_mask = num_splits * inner * tile_r != rows  # tail or phantom blocks

    if has_phantom:
        # Clamp phantom block indices onto the last real block (keeps the DMA
        # in bounds); their contribution is zeroed by the in-kernel row mask.
        def in_idx(s, k):
            return (jnp.minimum(s * inner + k, num_blocks - 1), 0)
    else:
        def in_idx(s, k):
            return (s * inner + k, 0)

    n_chunks = tile_r // chunk
    unroll = n_chunks if n_chunks <= 8 else 8

    kernel = functools.partial(
        _rmsd_kernel, rows=rows, tile_r=tile_r, chunk=chunk, inner=inner,
        needs_mask=needs_mask, unroll=unroll)

    block_bytes = tile_r * LANES * itemsize
    # 2 inputs x 2 pipeline buffers x block, plus headroom for the bounded
    # sub-chunk temporaries, accumulator scratch and output.
    vmem_limit = int(min(64 << 20, max(16 << 20, 4 * block_bytes + (4 << 20))))

    # TODO(synk): on v7x, confirm "parallel" shards the leading axis across
    # both TensorCores; if not, switch that axis to pltpu.CORE_PARALLEL.
    partials = pl.pallas_call(
        kernel,
        out_shape=jax.ShapeDtypeStruct((num_splits, 1), jnp.float32),
        grid=(num_splits, inner),
        in_specs=[
            pl.BlockSpec((tile_r, LANES), in_idx),
            pl.BlockSpec((tile_r, LANES), in_idx),
        ],
        out_specs=pl.BlockSpec((1, 1), lambda s, k: (s, 0)),
        scratch_shapes=[pltpu.VMEM((8, LANES), jnp.float32)],
        compiler_params=pltpu.CompilerParams(
            dimension_semantics=("parallel", "arbitrary"),
            vmem_limit_bytes=vmem_limit),
    )(out_slab, tgt_slab)

    return jnp.sqrt(jnp.sum(partials) / n_elems)


if __name__ == "__main__":
    key = jax.random.PRNGKey(0)
    k1, k2 = jax.random.split(key)

    # 1) Small aligned f32 case (copy-free slab, single block, no masking).
    shape = (2, 4, 16, 16)
    output = jax.random.normal(k1, shape, dtype=jnp.float32)
    target = jax.random.normal(k2, shape, dtype=jnp.float32)
    rmsd = rmsd_loss(output, target)
    jax.block_until_ready(rmsd)
    ref = jnp.sqrt(jnp.mean((output - target) ** 2))
    assert jnp.allclose(rmsd, ref, rtol=1e-5, atol=1e-6), (rmsd, ref)

    # 2) Irregular size: exercises the minimal tail pad + in-kernel row mask.
    m1 = jax.random.normal(k1, (3, 5, 77), dtype=jnp.float32)
    m2 = jax.random.normal(k2, (3, 5, 77), dtype=jnp.float32)
    got = rmsd_loss(m1, m2)
    want = jnp.sqrt(jnp.mean((m1 - m2) ** 2))
    jax.block_until_ready(got)
    assert jnp.allclose(got, want, rtol=1e-5, atol=1e-6), (got, want)

    # 3) Multi-block case with a partial tail block: exercises the grid
    #    accumulation, the pl.when-gated masked tail and the fast interior path.
    b1 = jax.random.normal(k1, (8200, 128), dtype=jnp.float32)
    b2 = jax.random.normal(k2, (8200, 128), dtype=jnp.float32)
    got_b = rmsd_loss(b1, b2)
    want_b = jnp.sqrt(jnp.mean((b1 - b2) ** 2))
    jax.block_until_ready(got_b)
    assert jnp.allclose(got_b, want_b, rtol=1e-4, atol=1e-6), (got_b, want_b)

    # 4) bf16 inputs: native-dtype streaming with in-kernel f32 upcast.
    h1 = jax.random.normal(k1, (16, 256), dtype=jnp.bfloat16)
    h2 = jax.random.normal(k2, (16, 256), dtype=jnp.bfloat16)
    got_h = rmsd_loss(h1, h2)
    want_h = jnp.sqrt(jnp.mean(
        (h1.astype(jnp.float32) - h2.astype(jnp.float32)) ** 2))
    jax.block_until_ready(got_h)
    assert jnp.allclose(got_h, want_h, rtol=1e-4, atol=1e-6), (got_h, want_h)

    print("KERNEL_OK")
</pallas_src>

<mosaic_0001>
module attributes {stable_mosaic.version = 11 : i64} {
  func.func @_rmsd_kernel(%arg0: i32, %arg1: i32, %arg2: memref<16x128xf32, #tpu.memory_space<vmem>>, %arg3: memref<16x128xf32, #tpu.memory_space<vmem>>, %arg4: memref<1x1xf32, #tpu.memory_space<vmem>>, %arg5: memref<8x128xf32, #tpu.memory_space<vmem>>) attributes {dimension_semantics = [#tpu.dimension_semantics<parallel>, #tpu.dimension_semantics<arbitrary>], iteration_bounds = array<i64: 1, 1>, scalar_prefetch = 0 : i64, scratch_operands = 1 : i64, tpu.core_type = #tpu.core_type<tc>, window_params = [{transform_indices = @transform_0, window_bounds = array<i64: 16, 128>}, {transform_indices = @transform_1, window_bounds = array<i64: 16, 128>}, {transform_indices = @transform_2, window_bounds = array<i64: 1, 1>}]} {
    %c0_i32 = arith.constant 0 : i32
    %0 = arith.cmpi eq, %arg1, %c0_i32 : i32
    %1 = arith.extui %0 : i1 to i32
    %c0_i32_0 = arith.constant 0 : i32
    %2 = arith.cmpi ne, %1, %c0_i32_0 : i32
    scf.if %2 {
      %cst_10 = arith.constant 0.000000e+00 : f32
      %21 = vector.broadcast %cst_10 : f32 to vector<8x128xf32>
      %c0_11 = arith.constant 0 : index
      %c0_12 = arith.constant 0 : index
      %22 = vector.load %arg5[%c0_11, %c0_12] : memref<8x128xf32, #tpu.memory_space<vmem>>, vector<8x128xf32>
      tpu.vector_store %arg5[%c0_11, %c0_12], %21 {strides = array<i32>} : memref<8x128xf32, #tpu.memory_space<vmem>>, vector<8x128xf32>,
    } else {
    }
    %cst = arith.constant 0.000000e+00 : f32
    %3 = vector.broadcast %cst : f32 to vector<8x128xf32>
    %c0_i32_1 = arith.constant 0 : i32
    %c16_i32 = arith.constant 16 : i32
    %4 = arith.muli %c0_i32_1, %c16_i32 : i32
    %5 = tpu.assume_multiple %4, 16 : i32
    %6 = arith.index_cast %5 : i32 to index
    %c0 = arith.constant 0 : index
    %7 = vector.load %arg2[%6, %c0] : memref<16x128xf32, #tpu.memory_space<vmem>>, vector<16x128xf32>
    %8 = arith.index_cast %5 : i32 to index
    %c0_2 = arith.constant 0 : index
    %9 = vector.load %arg3[%8, %c0_2] : memref<16x128xf32, #tpu.memory_space<vmem>>, vector<16x128xf32>
    %10 = arith.subf %7, %9 : vector<16x128xf32>
    %11 = arith.mulf %10, %10 : vector<16x128xf32>
    %12 = vector.shape_cast %11 : vector<16x128xf32> to vector<2x8x128xf32>
    %cst_3 = arith.constant dense<0.000000e+00> : vector<8x128xf32>
    %13 = vector.multi_reduction <add>, %12, %cst_3 [0] : vector<2x8x128xf32> to vector<8x128xf32>
    %14 = arith.addf %3, %13 : vector<8x128xf32>
    %c1_i32 = arith.constant 1 : i32
    %c0_4 = arith.constant 0 : index
    %c0_5 = arith.constant 0 : index
    %15 = vector.load %arg5[%c0_4, %c0_5] : memref<8x128xf32, #tpu.memory_space<vmem>>, vector<8x128xf32>
    %16 = arith.addf %15, %14 : vector<8x128xf32>
    %c0_6 = arith.constant 0 : index
    %c0_7 = arith.constant 0 : index
    %17 = vector.load %arg5[%c0_6, %c0_7] : memref<8x128xf32, #tpu.memory_space<vmem>>, vector<8x128xf32>
    tpu.vector_store %arg5[%c0_6, %c0_7], %16 {strides = array<i32>} : memref<8x128xf32, #tpu.memory_space<vmem>>, vector<8x128xf32>,
    %c0_i32_8 = arith.constant 0 : i32
    %18 = arith.cmpi eq, %arg1, %c0_i32_8 : i32
    %19 = arith.extui %18 : i1 to i32
    %c0_i32_9 = arith.constant 0 : i32
    %20 = arith.cmpi ne, %19, %c0_i32_9 : i32
    scf.if %20 {
      %c0_10 = arith.constant 0 : index
      %c0_11 = arith.constant 0 : index
      %21 = vector.load %arg5[%c0_10, %c0_11] : memref<8x128xf32, #tpu.memory_space<vmem>>, vector<8x128xf32>
      %22 = vector.shape_cast %21 : vector<8x128xf32> to vector<1x8x128xf32>
      %cst_12 = arith.constant dense<0.000000e+00> : vector<1xf32>
      %23 = vector.multi_reduction <add>, %22, %cst_12 [1, 2] : vector<1x8x128xf32> to vector<1xf32>
      %24 = vector.shape_cast %23 : vector<1xf32> to vector<1x1x1xf32>
      %25 = vector.extract %24[0, 0, 0] : f32 from vector<1x1x1xf32>
      %26 = vector.broadcast %25 : f32 to vector<1x1xf32>
      %c0_13 = arith.constant 0 : index
      %c0_14 = arith.constant 0 : index
      %27 = vector.load %arg4[%c0_13, %c0_14] : memref<1x1xf32, #tpu.memory_space<vmem>>, vector<1x1xf32>
      tpu.vector_store %arg4[%c0_13, %c0_14], %26 {strides = array<i32>} : memref<1x1xf32, #tpu.memory_space<vmem>>, vector<1x1xf32>,
    } else {
    }
    return
  }
  func.func @transform_0(%arg0: i32, %arg1: i32) -> (i32, i32) {
    %c1_i32 = arith.constant 1 : i32
    %0 = arith.muli %arg0, %c1_i32 : i32
    %1 = arith.addi %0, %arg1 : i32
    %c0_i32 = arith.constant 0 : i32
    %c0_i32_0 = arith.constant 0 : i32
    return %1, %c0_i32 : i32, i32
  }
  func.func @transform_1(%arg0: i32, %arg1: i32) -> (i32, i32) {
    %c1_i32 = arith.constant 1 : i32
    %0 = arith.muli %arg0, %c1_i32 : i32
    %1 = arith.addi %0, %arg1 : i32
    %c0_i32 = arith.constant 0 : i32
    %c0_i32_0 = arith.constant 0 : i32
    return %1, %c0_i32 : i32, i32
  }
  func.func @transform_2(%arg0: i32, %arg1: i32) -> (i32, i32) {
    %c0_i32 = arith.constant 0 : i32
    %c0_i32_0 = arith.constant 0 : i32
    return %arg0, %c0_i32 : i32, i32
  }
}

</mosaic_0001>

<bundles_post_ra>
// kernel: tpu_custom_call.1
= control target key start
LH: loop header
LB: loop body
LE: loop exit
PB: predicated region body
PF: predicated region fallthrough
CT: control target
= control target key end

     0   :  { %7 = vsyncpa [#allocation4], 0  ;;  %s222_s0 = inlined_call_operand.hbm [shape: f32[16,128], index: 0, kind: input, shape index: {}]   ;;  %s223_s1 = inlined_call_operand.hbm [shape: f32[16,128], index: 1, kind: input, shape index: {}]   ;;  %s224_s2 = inlined_call_operand.hbm [shape: f32[1,1], index: 2, kind: output, shape index: {}]  }
   0x1   :  { %8 = vsyncpa [#allocation7], 0 }
   0x2   :  { %9 = vsyncpa [#allocation5], 0  ;;  %s18_s11 = sshll.u32 %s222_s0, 4  ;;  %s193_s12 = smov [#allocation3]   ;;  %s19_s11 = int_to_ptr.hbm [resolvable:$true] %s18_s11 }
   0x3   :  { %s20_s13 = sshll.u32 %s193_s12, 4  ;;  %s35_s16 = sshll.u32 %s223_s1, 4  ;;  %s21_s13 = int_to_ptr.vmem [resolvable:$true] %s20_s13  ;;  %s36_s16 = int_to_ptr.hbm [resolvable:$true] %s35_s16 }
   0x4   :  { %s194_s17 = smov 128   ;;  %s195_s18 = smov 8  }
   0x5   :  { %26 = dma.hbm_to_vmem [thread:$0]  %s19_s11, 256, %s21_s13, [#allocation4], %s194_s17, %s194_s17, %s195_s18  }
   0x6   :  { %s196_s19 = smov [#allocation6]  }
   0x7   :  { %s37_s20 = sshll.u32 %s196_s19, 4  ;;  %s38_s20 = int_to_ptr.vmem [resolvable:$true] %s37_s20 }
   0x8   :  { %43 = dma.hbm_to_vmem [thread:$0]  %s36_s16, 256, %s38_s20, [#allocation7], %s194_s17, %s194_s17, %s195_s18  }
   0x9   :  { %187 = dma.done.wait [#allocation4], 256  }
   0xa   :  { %188 = vsyncadd [#allocation4], 4294967040 }
   0xb   :  { %189 = dma.done.wait [#allocation7], 256  }
   0xc   :  { %190 = vsyncadd [#allocation7], 4294967040  ;;  %v61_v0 = vld [vmem:[#allocation3] sm:$0xff]  ;;  %v62_v1 = vld [vmem:[#allocation3 + $0x8] sm:$0xff]  ;;  %s197_s0 = smov [#allocation8]   ;;  %s97_s23 = sshll.u32 %s224_s2, 4  ;;  %s98_s23 = int_to_ptr.hbm [resolvable:$true] %s97_s23 }
   0xd   :  { %v63_v2 = vld [vmem:[#allocation6] sm:$0xff]  ;;  %v64_v3 = vld [vmem:[#allocation6 + $0x8] sm:$0xff]  ;;  %s95_s1 = sshll.u32 %s197_s0, 4  ;;  %vm88_vm0 = vcmask 0   ;;  %s96_s1 = int_to_ptr.vmem [resolvable:$true] %s95_s1 }
   0xe   :  { %v65_v4 = vsub.f32 %v61_v0, %v63_v2  ;;  %v66_v5 = vsub.f32 %v62_v1, %v64_v3 }
  0x10   :  { %v67_v6 = vmul.f32 %v65_v4, %v65_v4  ;;  %v68_v7 = vmul.f32 %v66_v5, %v66_v5 }
  0x12   :  { %v69_v8 = vadd.f32 %v68_v7, %v67_v6 }
  0x14   :  { %78 = vadd.xlane.f32.xlu0 %v69_v8 }
  0x87   :  { %v79_v9 = vpop.xlane.xlu0 %78 }
  0x88   :  { %v80_v10 = vrot.slane %v79_v9, 4 }
  0x8a   :  { %v81_v11 = vadd.f32 %v80_v10, %v79_v9 }
  0x8c   :  { %v82_v12 = vrot.slane %v81_v11, 2 }
  0x8e   :  { %v83_v13 = vadd.f32 %v82_v12, %v81_v11 }
  0x90   :  { %v84_v14 = vrot.slane %v83_v13, 1 }
  0x92   :  { %v85_v15 = vadd.f32 %v84_v14, %v83_v13 }
  0x94   :  { %108 = vpush %v85_v15 }
  0xc5   :  { %s109_s24 = spop %108 }
  0xc6   :  { %v87_v16 = vstv %s109_s24 }
  0xc7   :  { %89 = vst.msk [vmem:[#allocation8] sm:$0x1] %vm88_vm0, %v87_v16 }
  0xc8   :  { %100 = dma.vmem_to_hbm [thread:$0]  %s96_s1, 16, %s98_s23, [#allocation5]  }
  0xc9   :  { %191 = dma.done.wait [#allocation5], 16  }
  0xca   :  { %192 = vsyncadd [#allocation5], 4294967280 }
  0xcb   :  { %105 = vsyncpa [#allocation4], 1 }
  0xcc   :  { %106 = vsyncpa [#allocation7], 1 }
  0xcd   :  { %107 = vsyncpa [#allocation5], 1 }

</bundles_post_ra>
